<compile_context>
chip_gen: v5e
topology: v5e:2x2
jax: 0.10.0
libtpu: 0.0.40
codegen_flags: <defaults>
</compile_context>

<pallas_src>
import jax
import jax.numpy as jnp
from jax.experimental import pallas as pl
from jax.experimental.pallas import tpu as pltpu


def _css_decoder_kernel(x_ref, w1_ref, b1_ref, w2_ref, b2_ref, o_ref):
    # Linear1 (MXU, f32 accumulation) + bias + ReLU (VPU, f32 epilogue)
    h = jnp.dot(x_ref[...], w1_ref[...], preferred_element_type=jnp.float32)
    h = jnp.maximum(h + b1_ref[...], 0.0)            # (TM, Hp) + (1, Hp)
    # Linear2 (MXU, f32 accumulation) + bias
    o = jnp.dot(h.astype(w2_ref.dtype), w2_ref[...],
                preferred_element_type=jnp.float32)
    o_ref[...] = (o + b2_ref[...]).astype(o_ref.dtype)


def _round_up(n, m):
    return ((n + m - 1) // m) * m


def prepare_decoder_params(w1, b1, w2, b2):
    """One-time parameter prep (outside the hot path).

    Pads the hidden dim to a multiple of 128 (lane alignment of the
    intermediate; numerically exact: ReLU(0)=0 and zero rows of w2 contribute
    nothing) and reshapes biases to (1, N) f32 rows.  out_dim is NOT padded.
    """
    two_h, hidden = w1.shape
    out_dim = w2.shape[1]
    h_pad = _round_up(hidden, 128)

    b1f = b1.astype(jnp.float32)
    b2f = b2.astype(jnp.float32)
    if h_pad != hidden:
        w1 = jnp.pad(w1, ((0, 0), (0, h_pad - hidden)))
        b1f = jnp.pad(b1f, (0, h_pad - hidden))
        w2 = jnp.pad(w2, ((0, h_pad - hidden), (0, 0)))
    return w1, b1f.reshape(1, h_pad), w2, b2f.reshape(1, out_dim)


def css_decoder_forward(x, w1p, b1p, w2p, b2p, *, row_tile=512, use_pallas=None):
    """x: (..., 2*hidden_dim) -> (..., input_dim).

    w1p/b1p/w2p/b2p must come from prepare_decoder_params (hidden padded to a
    multiple of 128, biases as (1, N) f32 rows).
    """
    lead_shape = x.shape[:-1]
    two_h = x.shape[-1]
    h_pad = w1p.shape[1]
    out_dim = w2p.shape[1]
    out_dtype = x.dtype

    x2d = x.reshape(-1, two_h)
    m = x2d.shape[0]

    # Tiny problems: pallas_call launch/DMA overhead dominates; use XLA.
    if use_pallas is None:
        use_pallas = m * two_h >= 64 * 1024
    if not use_pallas:
        h = jnp.maximum(x2d @ w1p + b1p, 0.0)
        y = (h @ w2p + b2p).astype(out_dtype)
        return y.reshape(*lead_shape, out_dim)

    # Row tile: multiple of 8, sized for pipeline depth (>=4 steps/TC on v7x),
    # not for VMEM (tiles are <1 MiB on every generation).  No row padding of
    # x -- pl.cdiv grid, Pallas masks the ragged final block.
    row_tile = max(8, _round_up(row_tile, 8))
    tm = m if m <= row_tile else row_tile
    grid = (pl.cdiv(m, tm),)

    itemsize = jnp.dtype(x2d.dtype).itemsize
    out_itemsize = jnp.dtype(out_dtype).itemsize
    w_itemsize = jnp.dtype(w1p.dtype).itemsize
    cost = pl.CostEstimate(
        flops=2 * m * (two_h * h_pad + h_pad * out_dim),
        transcendentals=0,
        bytes_accessed=(m * two_h * itemsize            # x read (dominant)
                        + m * out_dim * out_itemsize    # out write
                        + (two_h * h_pad + h_pad * out_dim) * w_itemsize
                        + (h_pad + out_dim) * 4),       # biases
    )

    out = pl.pallas_call(
        _css_decoder_kernel,
        out_shape=jax.ShapeDtypeStruct((m, out_dim), out_dtype),
        grid=grid,
        in_specs=[
            pl.BlockSpec((tm, two_h), lambda i: (i, 0)),       # x tile moves
            pl.BlockSpec((two_h, h_pad), lambda i: (0, 0)),    # weights stay
            pl.BlockSpec((1, h_pad), lambda i: (0, 0)),
            pl.BlockSpec((h_pad, out_dim), lambda i: (0, 0)),
            pl.BlockSpec((1, out_dim), lambda i: (0, 0)),
        ],
        out_specs=pl.BlockSpec((tm, out_dim), lambda i: (i, 0)),
        compiler_params=pltpu.CompilerParams(
            dimension_semantics=("parallel",)),                # v7x: both TCs
        cost_estimate=cost,
    )(x2d, w1p, b1p, w2p, b2p)

    return out.reshape(*lead_shape, out_dim)


def init_params(key, input_dim, hidden_dim, dtype=jnp.float32):
    """Deterministic init mirroring nn.Linear default (U(-1/sqrt(fan_in), +))."""
    k1, k2, k3, k4 = jax.random.split(key, 4)
    fan_in1 = 2 * hidden_dim
    fan_in2 = hidden_dim
    lim1 = 1.0 / jnp.sqrt(fan_in1)
    lim2 = 1.0 / jnp.sqrt(fan_in2)
    w1 = jax.random.uniform(k1, (2 * hidden_dim, hidden_dim), dtype,
                            minval=-lim1, maxval=lim1)
    b1 = jax.random.uniform(k2, (hidden_dim,), dtype, minval=-lim1, maxval=lim1)
    w2 = jax.random.uniform(k3, (hidden_dim, input_dim), dtype,
                            minval=-lim2, maxval=lim2)
    b2 = jax.random.uniform(k4, (input_dim,), dtype, minval=-lim2, maxval=lim2)
    return w1, b1, w2, b2


def _reference(x, w1, b1, w2, b2):
    h = jnp.maximum(x @ w1 + b1, 0.0)
    return h @ w2 + b2


if __name__ == "__main__":
    input_dim = 16
    hidden_dim = 32

    key = jax.random.PRNGKey(0)
    kx, kp, kx2, kx3 = jax.random.split(key, 4)
    w1, b1, w2, b2 = init_params(kp, input_dim, hidden_dim)
    w1p, b1p, w2p, b2p = prepare_decoder_params(w1, b1, w2, b2)   # once

    # --- small-shape test (single grid step, force the Pallas kernel) ---
    batch, seq = 2, 8
    x = jax.random.normal(kx, (batch, seq, 2 * hidden_dim), jnp.float32)
    y = css_decoder_forward(x, w1p, b1p, w2p, b2p, use_pallas=True)
    jax.block_until_ready(y)
    y_ref = _reference(x, w1, b1, w2, b2)
    assert y.shape == (batch, seq, input_dim), y.shape
    assert jnp.allclose(y, y_ref, atol=1e-5, rtol=1e-5), "small mismatch vs reference"

    # --- larger test exercising row tiling (M = 2048 -> 4 grid steps) ---
    batch2, seq2 = 4, 512
    x2 = jax.random.normal(kx2, (batch2, seq2, 2 * hidden_dim), jnp.float32)
    y2 = css_decoder_forward(x2, w1p, b1p, w2p, b2p, use_pallas=True,
                             row_tile=512)
    jax.block_until_ready(y2)
    y2_ref = _reference(x2, w1, b1, w2, b2)
    assert y2.shape == (batch2, seq2, input_dim), y2.shape
    assert jnp.allclose(y2, y2_ref, atol=1e-5, rtol=1e-5), "tiled mismatch vs reference"

    # --- ragged-final-block test (M = 515, not a multiple of the row tile) ---
    batch3, seq3 = 1, 515
    x3 = jax.random.normal(kx3, (batch3, seq3, 2 * hidden_dim), jnp.float32)
    y3 = css_decoder_forward(x3, w1p, b1p, w2p, b2p, use_pallas=True,
                             row_tile=512)
    jax.block_until_ready(y3)
    y3_ref = _reference(x3, w1, b1, w2, b2)
    assert y3.shape == (batch3, seq3, input_dim), y3.shape
    assert jnp.allclose(y3, y3_ref, atol=1e-5, rtol=1e-5), "ragged mismatch vs reference"

    print("KERNEL_OK")
</pallas_src>

<mosaic_0001>
module attributes {stable_mosaic.version = 11 : i64} {
  func.func @_css_decoder_kernel(%arg0: i32, %arg1: memref<16x64xf32, #tpu.memory_space<vmem>>, %arg2: memref<64x128xf32, #tpu.memory_space<vmem>>, %arg3: memref<1x128xf32, #tpu.memory_space<vmem>>, %arg4: memref<128x16xf32, #tpu.memory_space<vmem>>, %arg5: memref<1x16xf32, #tpu.memory_space<vmem>>, %arg6: memref<16x16xf32, #tpu.memory_space<vmem>>) attributes {dimension_semantics = [#tpu.dimension_semantics<parallel>], iteration_bounds = array<i64: 1>, scalar_prefetch = 0 : i64, scratch_operands = 0 : i64, tpu.core_type = #tpu.core_type<tc>, window_params = [{transform_indices = @transform_0, window_bounds = array<i64: 16, 64>}, {pipeline_mode = #tpu.pipeline_mode<synchronous>, transform_indices = @transform_1, window_bounds = array<i64: 64, 128>}, {pipeline_mode = #tpu.pipeline_mode<synchronous>, transform_indices = @transform_2, window_bounds = array<i64: 1, 128>}, {pipeline_mode = #tpu.pipeline_mode<synchronous>, transform_indices = @transform_3, window_bounds = array<i64: 128, 16>}, {pipeline_mode = #tpu.pipeline_mode<synchronous>, transform_indices = @transform_4, window_bounds = array<i64: 1, 16>}, {transform_indices = @transform_5, window_bounds = array<i64: 16, 16>}]} {
    %c0 = arith.constant 0 : index
    %c0_0 = arith.constant 0 : index
    %0 = vector.load %arg1[%c0, %c0_0] : memref<16x64xf32, #tpu.memory_space<vmem>>, vector<16x64xf32>
    %c0_1 = arith.constant 0 : index
    %c0_2 = arith.constant 0 : index
    %1 = vector.load %arg2[%c0_1, %c0_2] : memref<64x128xf32, #tpu.memory_space<vmem>>, vector<64x128xf32>
    %cst = arith.constant dense<0.000000e+00> : vector<16x128xf32>
    %2 = tpu.matmul %0, %1, %cst {dimension_numbers = #tpu.dot_dimension_numbers<[1], [0], [0], [1], [0, 0, 1, 1], [], []>} : vector<16x64xf32>, vector<64x128xf32>, vector<16x128xf32> -> vector<16x128xf32>
    %c0_3 = arith.constant 0 : index
    %c0_4 = arith.constant 0 : index
    %3 = vector.load %arg3[%c0_3, %c0_4] : memref<1x128xf32, #tpu.memory_space<vmem>>, vector<1x128xf32>
    %4 = vector.broadcast %3 : vector<1x128xf32> to vector<16x128xf32>
    %5 = arith.addf %2, %4 : vector<16x128xf32>
    %cst_5 = arith.constant 0.000000e+00 : f32
    %6 = vector.broadcast %cst_5 : f32 to vector<16x128xf32>
    %7 = arith.maximumf %5, %6 : vector<16x128xf32>
    %c0_6 = arith.constant 0 : index
    %c0_7 = arith.constant 0 : index
    %8 = vector.load %arg4[%c0_6, %c0_7] : memref<128x16xf32, #tpu.memory_space<vmem>>, vector<128x16xf32>
    %cst_8 = arith.constant dense<0.000000e+00> : vector<16x16xf32>
    %9 = tpu.matmul %7, %8, %cst_8 {dimension_numbers = #tpu.dot_dimension_numbers<[1], [0], [0], [1], [0, 0, 1, 1], [], []>} : vector<16x128xf32>, vector<128x16xf32>, vector<16x16xf32> -> vector<16x16xf32>
    %c0_9 = arith.constant 0 : index
    %c0_10 = arith.constant 0 : index
    %10 = vector.load %arg5[%c0_9, %c0_10] : memref<1x16xf32, #tpu.memory_space<vmem>>, vector<1x16xf32>
    %11 = vector.broadcast %10 : vector<1x16xf32> to vector<16x16xf32>
    %12 = arith.addf %9, %11 : vector<16x16xf32>
    %c0_11 = arith.constant 0 : index
    %c0_12 = arith.constant 0 : index
    %13 = vector.load %arg6[%c0_11, %c0_12] : memref<16x16xf32, #tpu.memory_space<vmem>>, vector<16x16xf32>
    tpu.vector_store %arg6[%c0_11, %c0_12], %12 {strides = array<i32>} : memref<16x16xf32, #tpu.memory_space<vmem>>, vector<16x16xf32>,
    return
  }
  func.func @transform_0(%arg0: i32) -> (i32, i32) {
    %c0_i32 = arith.constant 0 : i32
    %c0_i32_0 = arith.constant 0 : i32
    return %arg0, %c0_i32 : i32, i32
  }
  func.func @transform_1(%arg0: i32) -> (i32, i32) {
    %c0_i32 = arith.constant 0 : i32
    %c0_i32_0 = arith.constant 0 : i32
    %c0_i32_1 = arith.constant 0 : i32
    return %c0_i32, %c0_i32_0 : i32, i32
  }
  func.func @transform_2(%arg0: i32) -> (i32, i32) {
    %c0_i32 = arith.constant 0 : i32
    %c0_i32_0 = arith.constant 0 : i32
    %c0_i32_1 = arith.constant 0 : i32
    return %c0_i32, %c0_i32_0 : i32, i32
  }
  func.func @transform_3(%arg0: i32) -> (i32, i32) {
    %c0_i32 = arith.constant 0 : i32
    %c0_i32_0 = arith.constant 0 : i32
    %c0_i32_1 = arith.constant 0 : i32
    return %c0_i32, %c0_i32_0 : i32, i32
  }
  func.func @transform_4(%arg0: i32) -> (i32, i32) {
    %c0_i32 = arith.constant 0 : i32
    %c0_i32_0 = arith.constant 0 : i32
    %c0_i32_1 = arith.constant 0 : i32
    return %c0_i32, %c0_i32_0 : i32, i32
  }
  func.func @transform_5(%arg0: i32) -> (i32, i32) {
    %c0_i32 = arith.constant 0 : i32
    %c0_i32_0 = arith.constant 0 : i32
    return %arg0, %c0_i32 : i32, i32
  }
}

</mosaic_0001>

<bundles_post_ra>
// kernel: tpu_custom_call.1
= control target key start
LH: loop header
LB: loop body
LE: loop exit
PB: predicated region body
PF: predicated region fallthrough
CT: control target
= control target key end

     0   :  { %s302_s0 = inlined_call_operand.vmem [shape: f32[16,64], index: 0, kind: input, shape index: {}]   ;;  %s303_s1 = inlined_call_operand.vmem [shape: f32[64,128], index: 1, kind: input, shape index: {}]   ;;  %s304_s2 = inlined_call_operand.vmem [shape: f32[1,128], index: 2, kind: input, shape index: {}]   ;;  %s305_s3 = inlined_call_operand.vmem [shape: f32[128,16], index: 3, kind: input, shape index: {}]   ;;  %s306_s4 = inlined_call_operand.vmem [shape: f32[1,16], index: 4, kind: input, shape index: {}]   ;;  %s307_s5 = inlined_call_operand.hbm [shape: f32[16,16], index: 5, kind: output, shape index: {}]  }
   0x1   :  { %v30_v0 = vld [vmem:[%s303_s1 + $0x38] sm:$0xff]  ;;  %v29_v1 = vld [vmem:[%s303_s1 + $0x30] sm:$0xff]  ;;  %v28_v2 = vld [vmem:[%s303_s1 + $0x28] sm:$0xff] }
   0x2   :  { %50 = vmatpush.msra.mxu0 %v30_v0  ;;  %v82_v3 = vld [vmem:[%s305_s3 + $0x78] sm:$0xff]  ;;  %v81_v4 = vld [vmem:[%s305_s3 + $0x70] sm:$0xff]  ;;  %v27_v5 = vld [vmem:[%s303_s1 + $0x20] sm:$0xff] }
   0x3   :  { %87 = vmatpush.msra.mxu1 %v82_v3  ;;  %133 = vmatpush.msra.mxu2 %v82_v3  ;;  %v80_v6 = vld [vmem:[%s305_s3 + $0x68] sm:$0xff]  ;;  %v26_v7 = vld [vmem:[%s303_s1 + $0x18] sm:$0xff]  ;;  %v79_v8 = vld [vmem:[%s305_s3 + $0x60] sm:$0xff] }
   0x4   :  { %51 = vmatpush.msra.mxu0 %v29_v1  ;;  %v25_v9 = vld [vmem:[%s303_s1 + $0x10] sm:$0xff] }
   0x5   :  { %88 = vmatpush.msra.mxu1 %v81_v4  ;;  %134 = vmatpush.msra.mxu2 %v81_v4 }
   0x6   :  { %52 = vmatpush.msra.mxu0 %v28_v2 }
   0x7   :  { %89 = vmatpush.msra.mxu1 %v80_v6  ;;  %135 = vmatpush.msra.mxu2 %v80_v6 }
   0x8   :  { %53 = vmatpush.msra.mxu0 %v27_v5 }
   0x9   :  { %10 = vsyncpa [#allocation3], 0  ;;  %v78_v10 = vld [vmem:[%s305_s3 + $0x58] sm:$0xff]  ;;  %v24_v11 = vld [vmem:[%s303_s1 + $0x8] sm:$0xff]  ;;  %90 = vmatpush.msra.mxu1 %v79_v8  ;;  %136 = vmatpush.msra.mxu2 %v79_v8  ;;  %vm35_vm0 = vcmask 523264   ;;  %vm110_vm1 = vcmask 130048  }
   0xa   :  { %54 = vmatpush.msra.mxu0 %v26_v7  ;;  %v77_v12 = vld [vmem:[%s305_s3 + $0x50] sm:$0xff]  ;;  %v23_v13 = vld [vmem:[%s303_s1] sm:$0xff]  ;;  %v76_v15 = vld [vmem:[%s305_s3 + $0x48] sm:$0xff]  ;;  %s119_s24 = sshll.u32 %s307_s5, 4  ;;  %s181_s25 = smov 128   ;;  %s120_s24 = int_to_ptr.hbm [resolvable:$true] %s119_s24 }
   0xb   :  { %91 = vmatpush.msra.mxu1 %v78_v10  ;;  %137 = vmatpush.msra.mxu2 %v78_v10  ;;  %v21_v14 = vld [vmem:[%s302_s0] sm:$0xff]  ;;  %v74_v17 = vld [vmem:[%s305_s3 + $0x38] sm:$0xff]  ;;  %v73_v18 = vld [vmem:[%s305_s3 + $0x30] sm:$0xff]  ;;  %s182_s26 = smov 8  }
   0xc   :  { %55 = vmatpush.msra.mxu0 %v25_v9  ;;  %v75_v16 = vld [vmem:[%s305_s3 + $0x40] sm:$0xff]  ;;  %v22_v19 = vld [vmem:[%s302_s0 + $0x8] sm:$0xff]  ;;  %v70_v22 = vld [vmem:[%s305_s3 + $0x18] sm:$0xff] }
   0xd   :  { %92 = vmatpush.msra.mxu1 %v77_v12  ;;  %138 = vmatpush.msra.mxu2 %v77_v12  ;;  %v72_v20 = vld [vmem:[%s305_s3 + $0x28] sm:$0xff]  ;;  %v71_v21 = vld [vmem:[%s305_s3 + $0x20] sm:$0xff]  ;;  %v69_v23 = vld [vmem:[%s305_s3 + $0x10] sm:$0xff] }
   0xe   :  { %56 = vmatpush.msra.mxu0 %v24_v11  ;;  %v68_v24 = vld [vmem:[%s305_s3 + $0x8] sm:$0xff]  ;;  %v67_v25 = vld [vmem:[%s305_s3] sm:$0xff]  ;;  %s180_s3 = smov [#allocation2]  }
   0xf   :  { %93 = vmatpush.msra.mxu1 %v76_v15  ;;  %139 = vmatpush.msra.mxu2 %v76_v15  ;;  %v152_v26 = vld [vmem:[%s304_s2] ss:$0 sm:$0xff]  ;;  %s117_s22 = sshll.u32 %s180_s3, 4  ;;  %s118_s22 = int_to_ptr.vmem [resolvable:$true] %s117_s22 }
  0x10   :  { %57 = vmatpush.msra.mxu0 %v23_v13  ;;  %v153_v33 = vld [vmem:[%s306_s4] ss:$0 sm:$0xff] }
  0x11   :  { %131 = vmatmul.msk.f32.vlgmr.msra.gmra.mxu0 %vm35_vm0, %v21_v14  ;;  %94 = vmatpush.msra.mxu1 %v75_v16 }
  0x12   :  { %140 = vmatpush.msra.mxu2 %v75_v16 }
  0x13   :  { %95 = vmatpush.msra.mxu1 %v74_v17 }
  0x14   :  { %141 = vmatpush.msra.mxu2 %v74_v17 }
  0x15   :  { %96 = vmatpush.msra.mxu1 %v73_v18 }
  0x16   :  { %142 = vmatpush.msra.mxu2 %v73_v18 }
  0x17   :  { %97 = vmatpush.msra.mxu1 %v72_v20 }
  0x18   :  { %143 = vmatpush.msra.mxu2 %v72_v20 }
  0x19   :  { %132 = vmatmul.msk.f32.gmra.mxu0 %vm35_vm0, %v22_v19  ;;  %98 = vmatpush.msra.mxu1 %v71_v21 }
  0x1a   :  { %144 = vmatpush.msra.mxu2 %v71_v21 }
  0x1b   :  { %99 = vmatpush.msra.mxu1 %v70_v22 }
  0x1c   :  { %145 = vmatpush.msra.mxu2 %v70_v22 }
  0x1d   :  { %100 = vmatpush.msra.mxu1 %v69_v23 }
  0x1e   :  { %146 = vmatpush.msra.mxu2 %v69_v23 }
  0x1f   :  { %101 = vmatpush.msra.mxu1 %v68_v24 }
  0x20   :  { %147 = vmatpush.msra.mxu2 %v68_v24 }
  0x21   :  { %102 = vmatpush.msra.mxu1 %v67_v25 }
  0x22   :  { %148 = vmatpush.msra.mxu2 %v67_v25 }
  0x8e   :  { %v59_v27 = vpop.f32.mrf.mxu0 }
  0x8f   :  { %v60_v28 = vadd.f32 %v152_v26, %v59_v27 }
  0x91   :  { %v65_v29 = vmax.f32 %v60_v28, 0.0 }
  0x93   :  { %103 = vmatmul.f32.vlgmr.msra.gmra.mxu1 %v65_v29 }
  0x96   :  { %v62_v30 = vpop.f32.mrf.mxu0 }
  0x97   :  { %v63_v31 = vadd.f32 %v152_v26, %v62_v30 }
  0x99   :  { %v66_v32 = vmax.f32 %v63_v31, 0.0 }
  0x9b   :  { %106 = vmatmul.f32.vlgmr.msra.gmra.mxu2 %v66_v32 }
 0x110   :  { %v104_v34 = vpop.f32.mrf.mxu1 }
 0x111   :  { %v105_v35 = vadd.f32 %v153_v33, %v104_v34 }
 0x113   :  { %111 = vst.msk [vmem:[#allocation2] sm:$0xff] %vm110_vm1, %v105_v35 }
 0x11e   :  { %v107_v36 = vpop.f32.mrf.mxu2 }
 0x11f   :  { %v108_v37 = vadd.f32 %v153_v33, %v107_v36 }
 0x121   :  { %112 = vst.msk [vmem:[#allocation2 + $0x8] sm:$0xff] %vm110_vm1, %v108_v37 }
 0x122   :  { %125 = dma.vmem_to_hbm [thread:$0]  %s118_s22, 256, %s120_s24, [#allocation3], %s181_s25, %s181_s25, %s182_s26  }
 0x123   :  { %178 = dma.done.wait [#allocation3], 256  }
 0x124   :  { %179 = vsyncadd [#allocation3], 4294967040 }
 0x125   :  { %130 = vsyncpa [#allocation3], 1 }

</bundles_post_ra>
